<compile_context>
chip_gen: v5e
topology: v5e:2x2
jax: 0.10.0
libtpu: 0.0.40
codegen_flags: <defaults>
</compile_context>

<pallas_src>
import functools

import numpy as np

import jax
import jax.numpy as jnp
from jax.experimental import pallas as pl
from jax.experimental.pallas import tpu as pltpu


# ----------------------------- layout constants -----------------------------

_PAD = 3
_HIN = 28                        # input spatial size implied by fc1 = Linear(512, 32)
_KIN = _HIN * _HIN               # 784  flattened raw image (1 channel)
_K1P = 7 * 128                   # 896  lane-padded K for conv1 matmul

_C1, _KS1, _S1 = 16, 8, 2
_OH1 = (_HIN + 2 * _PAD - _KS1) // _S1 + 1   # 14  conv1 output spatial
_N1 = _C1 * _OH1 * _OH1          # 3136 conv1 flat (channel-major)
_N1P = 25 * 128                  # 3200 lane-padded

_C2, _KS2, _S2 = 32, 4, 2
_PH1 = _OH1 - 1                  # 13  pool1 output spatial
_OH2 = (_PH1 - _KS2) // _S2 + 1  # 5   conv2 output spatial
_N2 = _C2 * _OH2 * _OH2          # 800
_N2P = 7 * 128                   # 896 lane-padded

_PH2 = _OH2 - 1                  # 4   pool2 output spatial (fc1 in = 32*16 = 512)
_NFC = 128                       # lane-padded fc width (fc1 out 32, fc2 out nclass)


# ------------------------------ Pallas kernels -------------------------------

def _smallnn_fused_kernel(x_ref, w1_ref, b1_ref, w2_ref, b2_ref,
                          wf1_ref, bf1_ref, wf2_ref, bf2_ref, o_ref,
                          *, roll_flipped):
    """Entire SmallNN forward for one batch tile; everything stays in VMEM."""
    f32, bf16 = jnp.float32, jnp.bfloat16

    def shift_from(v, k):
        # result[..., l] = v[..., (l + k) % L]  (lane rotation, runs on the XLU)
        length = v.shape[-1]
        s = k if roll_flipped else (length - k)
        return pltpu.roll(v, s, axis=v.ndim - 1)       # axis must be >= 0

    def maxpool_2x2_s1_flat(v, row_stride):
        # 2x2 / stride-1 max pool on a channel-major flat (c, h, w) layout:
        # out lane (c, h, w) = max over (h..h+1, w..w+1).  Boundary lanes hold
        # garbage but are never referenced by the next (folded) weight.
        m = jnp.maximum(v, shift_from(v, 1))
        return jnp.maximum(m, shift_from(m, row_stride))

    # conv1 (zero padding folded into the dense weight, K = 896 lanes)
    a1 = jnp.dot(x_ref[...], w1_ref[...], preferred_element_type=f32)
    a1 = jnp.tanh(a1 + b1_ref[...])
    p1 = maxpool_2x2_s1_flat(a1, _OH1)                       # (TB, 3200)

    # conv2 (dense matmul over the pooled channel-major flat map)
    a2 = jnp.dot(p1.astype(bf16), w2_ref[...], preferred_element_type=f32)
    a2 = jnp.tanh(a2 + b2_ref[...])
    p2 = maxpool_2x2_s1_flat(a2, _OH2)                       # (TB, 896)

    # fc1 (NCHW flatten folded into the remapped weight) + tanh, then fc2
    h = jnp.tanh(jnp.dot(p2.astype(bf16), wf1_ref[...],
                         preferred_element_type=f32) + bf1_ref[...])
    out = jnp.dot(h.astype(bf16), wf2_ref[...],
                  preferred_element_type=f32) + bf2_ref[...]
    o_ref[...] = out.astype(o_ref.dtype)


def _roll_probe_kernel(x_ref, o_ref):
    o_ref[...] = pltpu.roll(x_ref[...], 1, axis=1)           # axis must be >= 0


def roll_is_flipped():
    """One-time check of pltpu.roll's rotation direction so the pooling taps
    are robust across conventions: True iff roll(x, +1)[l] == x[l + 1]."""
    x = jnp.tile(jnp.arange(128, dtype=jnp.float32)[None, :], (8, 1))
    y = pl.pallas_call(
        _roll_probe_kernel,
        out_shape=jax.ShapeDtypeStruct((8, 128), jnp.float32),
    )(x)
    return bool(y[0, 0] == 1.0)


# --------------------- one-time weight folding (init side) -------------------

def _fold_conv_to_dense(w_hwio, cin, in_hw, stride, pad, out_hw, k_pad, n_pad):
    """Dense (k_pad, n_pad) matrix D with
    (x_flat @ D)[:, (co*out_hw + oy)*out_hw + ox] == conv(x, w)[:, oy, ox, co],
    where x_flat lane index is (ci*in_hw + iy)*in_hw + ix (channel-major).
    Taps that fall into the zero-padding region are dropped (they contribute 0)."""
    kh, kw, cin_w, cout = w_hwio.shape
    assert cin_w == cin and k_pad >= cin * in_hw * in_hw
    w_np = np.asarray(w_hwio, dtype=np.float32)
    i, j, ci, co, oy, ox = np.meshgrid(
        np.arange(kh), np.arange(kw), np.arange(cin), np.arange(cout),
        np.arange(out_hw), np.arange(out_hw), indexing="ij")
    iy = stride * oy + i - pad
    ix = stride * ox + j - pad
    valid = ((iy >= 0) & (iy < in_hw) & (ix >= 0) & (ix < in_hw)).ravel()
    k_idx = ((ci * in_hw + iy) * in_hw + ix).ravel()[valid]
    n_idx = ((co * out_hw + oy) * out_hw + ox).ravel()[valid]
    dense = np.zeros((k_pad, n_pad), np.float32)
    dense[k_idx, n_idx] = w_np[i.ravel()[valid], j.ravel()[valid],
                               ci.ravel()[valid], co.ravel()[valid]]
    return dense


def _fold_fc1(wf1, cout, pre_hw, pool_hw, rows, n_pad):
    """Remap fc1 rows from torch's NCHW flatten order ((co*pool+oy)*pool+ox)
    to the kernel's channel-major flat pooled layout ((co*pre+oy)*pre+ox),
    folding the flatten/transpose into the weight; zero-pads rows/cols."""
    w_np = np.asarray(wf1, dtype=np.float32)
    n_in, n_out = w_np.shape
    assert n_in == cout * pool_hw * pool_hw
    co, oy, ox = np.meshgrid(np.arange(cout), np.arange(pool_hw),
                             np.arange(pool_hw), indexing="ij")
    src = ((co * pool_hw + oy) * pool_hw + ox).ravel()
    dst = ((co * pre_hw + oy) * pre_hw + ox).ravel()
    dense = np.zeros((rows, n_pad), np.float32)
    dense[dst, :n_out] = w_np[src, :]
    return dense


def _valid_pool_lanes(cout, grid_hw, pool_hw):
    """Lane indices that hold a VALID pooled value on the flat layout."""
    co, y, x = np.meshgrid(np.arange(cout), np.arange(pool_hw),
                           np.arange(pool_hw), indexing="ij")
    return np.unique(((co * grid_hw + y) * grid_hw + x).ravel())


def _nonzero_rows_subset(mat, valid_rows):
    nz = np.nonzero(np.any(mat != 0.0, axis=1))[0]
    return bool(np.all(np.isin(nz, valid_rows)))


def prepare_params(params):
    """Fold conv/fc weights into the lane-dense kernel layout (one-time)."""
    (w1, b1, w2, b2, wf1, bf1, wf2, bf2) = params
    nclass = wf2.shape[1]
    bf16, f32 = jnp.bfloat16, jnp.float32

    # conv1: zero padding folded into the weight; K padded 784 -> 896 lanes.
    w1d_np = _fold_conv_to_dense(w1, 1, _HIN, _S1, _PAD, _OH1, _K1P, _N1P)
    # conv2 over the pooled (row-stride 14) flat map, no padding.
    w2d_np = _fold_conv_to_dense(w2, _C1, _OH1, _S2, 0, _OH2, _N1P, _N2P)
    # fc1 with torch's NCHW flatten folded into the row remap.
    wf1d_np = _fold_fc1(wf1, _C2, _OH2, _PH2, _N2P, _NFC)

    # Safety: the roll-based pooling leaves garbage in lanes whose 2x2 window
    # wraps a row/channel boundary; those lanes must never be read downstream.
    assert _nonzero_rows_subset(w2d_np, _valid_pool_lanes(_C1, _OH1, _PH1)), \
        "w2d reads an invalid pooled lane"
    assert _nonzero_rows_subset(wf1d_np, _valid_pool_lanes(_C2, _OH2, _PH2)), \
        "wf1d reads an invalid pooled lane"

    w1d = jnp.asarray(w1d_np, bf16)
    w2d = jnp.asarray(w2d_np, bf16)
    wf1d = jnp.asarray(wf1d_np, bf16)

    b1f = jnp.pad(jnp.repeat(b1, _OH1 * _OH1),
                  (0, _N1P - _N1)).reshape(1, _N1P).astype(f32)
    b2f = jnp.pad(jnp.repeat(b2, _OH2 * _OH2),
                  (0, _N2P - _N2)).reshape(1, _N2P).astype(f32)
    bf1p = jnp.pad(bf1, (0, _NFC - bf1.shape[0])).reshape(1, _NFC).astype(f32)
    wf2p = jnp.asarray(
        np.pad(np.asarray(wf2, np.float32),
               ((0, _NFC - wf2.shape[0]), (0, _NFC - nclass))), bf16)
    bf2p = jnp.pad(bf2, (0, _NFC - nclass)).reshape(1, _NFC).astype(f32)

    return (w1d, b1f, w2d, b2f, wf1d, bf1p, wf2p, bf2p)


# --------------------------------- forward -----------------------------------

def small_nn_forward(x_nchw, kparams, *, nclass=10, roll_flipped=False):
    """Fused Pallas forward; returns (B, nclass) logits (PyTorch semantics)."""
    (w1d, b1f, w2d, b2f, wf1d, bf1p, wf2p, bf2p) = kparams
    B, C, H, W = x_nchw.shape
    assert C == 1 and H == _HIN and W == _HIN

    # Input-side glue only: flatten the single-channel image (conv1's zero
    # padding lives in w1d), lane-pad 784 -> 896, cast bf16.
    x = x_nchw.reshape(B, _KIN).astype(jnp.bfloat16)
    x = jnp.pad(x, ((0, 0), (0, _K1P - _KIN)))

    # Batch tile: sublane-aligned, capped at 256 rows so a tile feeds the full
    # 256-row MXU on v6e/v7x while staying well inside the 40 MiB VMEM budget
    # (weights are single-buffered below).
    tb = min(256, ((B + 7) // 8) * 8)
    bp = ((B + tb - 1) // tb) * tb
    if bp != B:
        x = jnp.pad(x, ((0, bp - B), (0, 0)))
    grid_steps = bp // tb

    # Megacore batch split duplicates the ~11.5 MB weight DMA per core; only
    # pay that when there are enough grid steps for it to win (large batch).
    dim_sem = ("parallel",) if grid_steps >= 4 else ("arbitrary",)

    kernel = functools.partial(_smallnn_fused_kernel, roll_flipped=roll_flipped)
    full = lambda i: (0, 0)
    # Grid-invariant weights/biases: fetch once, single VMEM buffer.
    wspec = lambda shape: pl.BlockSpec(shape, full, pipeline_mode=pl.Buffered(1))
    out = pl.pallas_call(
        kernel,
        out_shape=jax.ShapeDtypeStruct((bp, _NFC), jnp.float32),
        grid=(grid_steps,),
        in_specs=[
            pl.BlockSpec((tb, _K1P), lambda i: (i, 0)),
            wspec((_K1P, _N1P)), wspec((1, _N1P)),
            wspec((_N1P, _N2P)), wspec((1, _N2P)),
            wspec((_N2P, _NFC)), wspec((1, _NFC)),
            wspec((_NFC, _NFC)), wspec((1, _NFC)),
        ],
        out_specs=pl.BlockSpec((tb, _NFC), lambda i: (i, 0)),
        compiler_params=pltpu.CompilerParams(
            dimension_semantics=dim_sem,
            vmem_limit_bytes=40 * 1024 * 1024),
    )(x, w1d, b1f, w2d, b2f, wf1d, bf1p, wf2p, bf2p)
    return out[:B, :nclass]


# ----------------------------- parameter creation ----------------------------

def init_params(key, nclass=10):
    k1, k2, k3, k4 = jax.random.split(key, 4)
    # conv weights stored HWIO (kh, kw, in, out); kaiming-normal style std.
    std1 = (1.0 / (_KS1 * _KS1 * 1)) ** 0.5
    w1 = std1 * jax.random.normal(k1, (_KS1, _KS1, 1, _C1), jnp.float32)
    b1 = jnp.zeros((_C1,), jnp.float32)
    std2 = (1.0 / (_KS2 * _KS2 * _C1)) ** 0.5
    w2 = std2 * jax.random.normal(k2, (_KS2, _KS2, _C1, _C2), jnp.float32)
    b2 = jnp.zeros((_C2,), jnp.float32)
    # fc weights stored (in, out); xavier-normal std.
    stdf1 = (2.0 / (512 + 32)) ** 0.5
    wf1 = stdf1 * jax.random.normal(k3, (512, 32), jnp.float32)
    bf1 = jnp.zeros((32,), jnp.float32)
    stdf2 = (2.0 / (32 + nclass)) ** 0.5
    wf2 = stdf2 * jax.random.normal(k4, (32, nclass), jnp.float32)
    bf2 = jnp.zeros((nclass,), jnp.float32)
    return (w1, b1, w2, b2, wf1, bf1, wf2, bf2)


# ----------------------------- pure-JAX reference ----------------------------

def reference_forward(x_nchw, params):
    (w1, b1, w2, b2, wf1, bf1, wf2, bf2) = params
    w1_oihw = jnp.transpose(w1, (3, 2, 0, 1))
    y = jax.lax.conv_general_dilated(
        x_nchw, w1_oihw, (2, 2), ((3, 3), (3, 3)),
        dimension_numbers=('NCHW', 'OIHW', 'NCHW'))
    y = jnp.tanh(y + b1[None, :, None, None])
    y = jax.lax.reduce_window(y, -jnp.inf, jax.lax.max,
                              (1, 1, 2, 2), (1, 1, 1, 1), 'VALID')
    w2_oihw = jnp.transpose(w2, (3, 2, 0, 1))
    y = jax.lax.conv_general_dilated(
        y, w2_oihw, (2, 2), ((0, 0), (0, 0)),
        dimension_numbers=('NCHW', 'OIHW', 'NCHW'))
    y = jnp.tanh(y + b2[None, :, None, None])
    y = jax.lax.reduce_window(y, -jnp.inf, jax.lax.max,
                              (1, 1, 2, 2), (1, 1, 1, 1), 'VALID')
    y = y.reshape(y.shape[0], -1)
    y = jnp.tanh(y @ wf1 + bf1)
    return y @ wf2 + bf2


if __name__ == "__main__":
    key = jax.random.PRNGKey(0)
    kx, kp = jax.random.split(key)
    # MNIST-shaped input: 28x28 is implied by fc1 = Linear(32*16, 32).
    x = jax.random.normal(kx, (2, 1, 28, 28), jnp.float32)
    params = init_params(kp, nclass=10)

    flipped = roll_is_flipped()        # one-time rotate-direction probe (eager)
    kparams = prepare_params(params)   # one-time weight folding + bf16 cast

    fwd = jax.jit(functools.partial(small_nn_forward, nclass=10,
                                    roll_flipped=flipped))
    out = jax.block_until_ready(fwd(x, kparams))
    assert out.shape == (2, 10), out.shape

    ref = reference_forward(x, params)
    # Intentional tolerance: bf16 MXU inputs (f32 accumulate) + folded
    # (reordered) accumulation vs. the all-f32 reference.
    max_err = float(jnp.max(jnp.abs(out - ref)))
    assert bool(jnp.allclose(out, ref, atol=7.5e-2, rtol=5e-2)), max_err

    print("KERNEL_OK")
</pallas_src>

<mosaic_0001>
module attributes {stable_mosaic.version = 11 : i64} {
  func.func @_roll_probe_kernel(%arg0: memref<8x128xf32, #tpu.memory_space<vmem>>, %arg1: memref<8x128xf32, #tpu.memory_space<vmem>>) attributes {dimension_semantics = [], scalar_prefetch = 0 : i64, scratch_operands = 0 : i64, tpu.core_type = #tpu.core_type<tc>} {
    %c0 = arith.constant 0 : index
    %c0_0 = arith.constant 0 : index
    %0 = vector.load %arg0[%c0, %c0_0] : memref<8x128xf32, #tpu.memory_space<vmem>>, vector<8x128xf32>
    %c1_i32 = arith.constant 1 : i32
    %1 = tpu.dynamic_rotate %0 by %c1_i32 dim 1 : vector<8x128xf32>, i32 -> vector<8x128xf32>
    %c0_1 = arith.constant 0 : index
    %c0_2 = arith.constant 0 : index
    %2 = vector.load %arg1[%c0_1, %c0_2] : memref<8x128xf32, #tpu.memory_space<vmem>>, vector<8x128xf32>
    tpu.vector_store %arg1[%c0_1, %c0_2], %1 {strides = array<i32>} : memref<8x128xf32, #tpu.memory_space<vmem>>, vector<8x128xf32>,
    return
  }
}

</mosaic_0001>

<bundles_post_ra>
// kernel: tpu_custom_call.1
= control target key start
LH: loop header
LB: loop body
LE: loop exit
PB: predicated region body
PF: predicated region fallthrough
CT: control target
= control target key end

     0   :  { %6 = vsyncpa [#allocation3], 0  ;;  %s118_s0 = inlined_call_operand.hbm [shape: f32[8,128], index: 0, kind: input, shape index: {}]   ;;  %s119_s1 = inlined_call_operand.hbm [shape: f32[8,128], index: 1, kind: output, shape index: {}]  }
   0x1   :  { %7 = vsyncpa [#allocation4], 0  ;;  %s13_s8 = sshll.u32 %s118_s0, 4  ;;  %s99_s9 = smov [#allocation2]   ;;  %s14_s8 = int_to_ptr.hbm [resolvable:$true] %s13_s8 }
   0x2   :  { %s15_s10 = sshll.u32 %s99_s9, 4  ;;  %s16_s10 = int_to_ptr.vmem [resolvable:$true] %s15_s10 }
   0x3   :  { %18 = dma.hbm_to_vmem [thread:$0]  %s14_s8, 128, %s16_s10, [#allocation3]  }
   0x4   :  { %95 = dma.done.wait [#allocation3], 128  }
   0x5   :  { %96 = vsyncadd [#allocation3], 4294967168  ;;  %v23_v0 = vld [vmem:[#allocation2] sm:$0xff]  ;;  %s100_s11 = smov 1   ;;  %s101_s12 = smov [#allocation5]  }
   0x6   :  { %24 = vrot.lane.b32.xlu0 %v23_v0, %s100_s11  ;;  %s32_s13 = sshll.u32 %s101_s12, 4  ;;  %s34_s16 = sshll.u32 %s119_s1, 4  ;;  %s33_s13 = int_to_ptr.vmem [resolvable:$true] %s32_s13  ;;  %s35_s16 = int_to_ptr.hbm [resolvable:$true] %s34_s16 }
  0x78   :  { %v25_v1 = vpop.permute.xlu0 %24 }
  0x79   :  { %26 = vst [vmem:[#allocation5] sm:$0xff] %v25_v1 }
  0x7a   :  { %37 = dma.vmem_to_hbm [thread:$0]  %s33_s13, 128, %s35_s16, [#allocation4]  }
  0x7b   :  { %97 = dma.done.wait [#allocation4], 128  }
  0x7c   :  { %98 = vsyncadd [#allocation4], 4294967168 }
  0x7d   :  { %42 = vsyncpa [#allocation3], 1 }
  0x7e   :  { %43 = vsyncpa [#allocation4], 1 }

</bundles_post_ra>
